<compile_context>
chip_gen: v7x
topology: tpu7x:2x2x1
jax: 0.10.0
libtpu: 0.0.40
codegen_flags: <defaults>
</compile_context>

<pallas_src>
import functools

import jax
import jax.numpy as jnp
from jax.experimental import pallas as pl
from jax.experimental.pallas import tpu as pltpu


def _round_up(x: int, m: int) -> int:
    return ((x + m - 1) // m) * m


def _return_kernel(x_ref, out_ref, *, c: int, s: int):
    """x_ref: (TILE, s*c); each row = one stride-group of the time axis.

    den = lanes [0:c]        (time offset 0 within the group)
    num = lanes [(s-1)*c:sc] (time offset s-1 within the group)
    out = num / (den + sign_eps(den)) - 1.0
    """
    den = x_ref[:, 0:c]
    num = x_ref[:, (s - 1) * c : s * c]
    eps = jnp.asarray(1e-7, den.dtype)
    signed_eps = jnp.where(den < 0, -eps, eps)   # den == 0 -> +eps (matches PyTorch)
    one = jnp.asarray(1.0, den.dtype)
    out_ref[...] = (num / (den + signed_eps) - one).astype(out_ref.dtype)


def return_forward(feature: jax.Array, stride: int = 10, *, tile_rows: int | None = None):
    """feature: [B, T, C] -> [B, N, C] with N = len(range(stride-1, T, stride))."""
    B, T, C = feature.shape
    N = len(range(stride - 1, T, stride))
    if N == 0:
        return jnp.zeros((B, 0, C), feature.dtype)

    # Trim trailing rows that feed neither numerator nor (matched) denominator.
    # When T % stride == 0 this is a no-op view.
    x = feature[:, : N * stride, :]
    rows = B * N
    # Free, contiguous reshape: row r = (b, n) holds feature[b, n*stride : (n+1)*stride, :].
    x2d = x.reshape(rows, stride * C)

    if tile_rows is None:
        tile_rows = 2048                      # ~2.6 MiB/operand-tile at C=32 f32
    tile = min(_round_up(tile_rows, 8), _round_up(rows, 8))
    grid = (pl.cdiv(rows, tile),)

    kernel = functools.partial(_return_kernel, c=C, s=stride)

    out2d = pl.pallas_call(
        kernel,
        out_shape=jax.ShapeDtypeStruct((rows, C), feature.dtype),
        grid=grid,
        in_specs=[pl.BlockSpec((tile, stride * C), lambda i: (i, 0))],
        out_specs=pl.BlockSpec((tile, C), lambda i: (i, 0)),
        compiler_params=pltpu.CompilerParams(
            dimension_semantics=("parallel",),
            vmem_limit_bytes=32 * 1024 * 1024,
        ),
    )(x2d)

    return out2d.reshape(B, N, C)


def _reference(feature: jax.Array, stride: int = 10) -> jax.Array:
    num = feature[:, stride - 1::stride, :]
    den = feature[:, 0::stride, :][:, : num.shape[1], :]
    eps = jnp.where(den < 0, -1e-7, 1e-7).astype(den.dtype)
    return num / (den + eps) - 1.0


if __name__ == "__main__":
    stride = 10
    key = jax.random.PRNGKey(0)
    k1, k2 = jax.random.split(key)

    # Test 1: small shape consistent with the module ([B, T, C], T multiple of stride).
    B, T, C = 2, 40, 32
    feature = jax.random.normal(k1, (B, T, C), dtype=jnp.float32)
    out = jax.block_until_ready(return_forward(feature, stride=stride))
    ref = _reference(feature, stride=stride)
    assert out.shape == (B, T // stride, C), out.shape
    assert jnp.allclose(out, ref, rtol=1e-5, atol=1e-5), "mismatch vs reference (test 1)"

    # Test 2: exercises a multi-step grid and a ragged final block.
    B2, T2, C2 = 2, 200, 32
    f2 = jax.random.normal(k2, (B2, T2, C2), dtype=jnp.float32)
    out2 = jax.block_until_ready(return_forward(f2, stride=stride, tile_rows=16))
    ref2 = _reference(f2, stride=stride)
    assert out2.shape == (B2, T2 // stride, C2), out2.shape
    assert jnp.allclose(out2, ref2, rtol=1e-5, atol=1e-5), "mismatch vs reference (test 2)"

    print("KERNEL_OK")
</pallas_src>

<mosaic_0001>
module attributes {stable_mosaic.version = 11 : i64} {
  func.func @_return_kernel(%arg0: i32, %arg1: memref<8x320xf32, #tpu.memory_space<vmem>>, %arg2: memref<8x32xf32, #tpu.memory_space<vmem>>) attributes {dimension_semantics = [#tpu.dimension_semantics<parallel>], iteration_bounds = array<i64: 1>, scalar_prefetch = 0 : i64, scratch_operands = 0 : i64, tpu.core_type = #tpu.core_type<tc>, window_params = [{transform_indices = @transform_0, window_bounds = array<i64: 8, 320>}, {transform_indices = @transform_1, window_bounds = array<i64: 8, 32>}]} {
    %c0 = arith.constant 0 : index
    %c0_0 = arith.constant 0 : index
    %0 = vector.load %arg1[%c0, %c0_0] : memref<8x320xf32, #tpu.memory_space<vmem>>, vector<8x32xf32>
    %c0_1 = arith.constant 0 : index
    %c288 = arith.constant 288 : index
    %1 = vector.load %arg1[%c0_1, %c288] : memref<8x320xf32, #tpu.memory_space<vmem>>, vector<8x32xf32>
    %cst = arith.constant 0.000000e+00 : f32
    %2 = vector.broadcast %cst : f32 to vector<8x32xf32>
    %3 = arith.cmpf olt, %0, %2 : vector<8x32xf32>
    %cst_2 = arith.constant 0.000000e+00 : f32
    %cst_3 = arith.constant 1.000000e-07 : f32
    %4 = arith.subf %cst_2, %cst_3 : f32
    %cst_4 = arith.constant 1.000000e-07 : f32
    %5 = vector.broadcast %4 : f32 to vector<8x32xf32>
    %6 = vector.broadcast %cst_4 : f32 to vector<8x32xf32>
    %7 = arith.select %3, %5, %6 : vector<8x32xi1>, vector<8x32xf32>
    %8 = arith.addf %0, %7 : vector<8x32xf32>
    %9 = arith.divf %1, %8 : vector<8x32xf32>
    %cst_5 = arith.constant 1.000000e+00 : f32
    %10 = vector.broadcast %cst_5 : f32 to vector<8x32xf32>
    %11 = arith.subf %9, %10 : vector<8x32xf32>
    %c0_6 = arith.constant 0 : index
    %c0_7 = arith.constant 0 : index
    %12 = vector.load %arg2[%c0_6, %c0_7] : memref<8x32xf32, #tpu.memory_space<vmem>>, vector<8x32xf32>
    tpu.vector_store %arg2[%c0_6, %c0_7], %11 {strides = array<i32>} : memref<8x32xf32, #tpu.memory_space<vmem>>, vector<8x32xf32>,
    return
  }
  func.func @transform_0(%arg0: i32) -> (i32, i32) {
    %c0_i32 = arith.constant 0 : i32
    %c0_i32_0 = arith.constant 0 : i32
    return %arg0, %c0_i32 : i32, i32
  }
  func.func @transform_1(%arg0: i32) -> (i32, i32) {
    %c0_i32 = arith.constant 0 : i32
    %c0_i32_0 = arith.constant 0 : i32
    return %arg0, %c0_i32 : i32, i32
  }
}

</mosaic_0001>

<bundles_post_ra>
// kernel: tpu_custom_call.1
= control target key start
LH: loop header
LB: loop body
LE: loop exit
PB: predicated region body
PF: predicated region fallthrough
CT: control target
= control target key end

     0   :  { %6 = vsyncpa [#allocation3], 0  ;;  %s149_s0 = inlined_call_operand.hbm [shape: f32[8,320], index: 0, kind: input, shape index: {}]   ;;  %s150_s1 = inlined_call_operand.hbm [shape: f32[8,32], index: 1, kind: output, shape index: {}]  }
   0x1   :  { %7 = vsyncpa [#allocation4], 0  ;;  %s110_s6 = smov [#allocation2]   ;;  %s62_s10 = scalar_lea.hbm %s149_s0, 384 }
   0x2   :  { %s14_s7 = sshll.u32 %s110_s6, 4  ;;  %p63_p0 = scmp.ne.s32.totalorder %s149_s0, %s62_s10  ;;  %s15_s7 = int_to_ptr.vmem [resolvable:$true] %s14_s7 }
   0x3   :  { %p66_p1 = scmp.lt.u32.totalorder %s62_s10, %s149_s0 }
   0x5   :  { %p68_p2 = pnand %p66_p1, %p63_p0 }
   0x7   :  { %71 = shalt.err (!%p68_p2)
}
   0x8   :  { %s72_s15 = scalar_lea.vmem %s15_s7, 384  ;;  %p77_p4 = scmp.lt.s32.totalorder %s15_s7, %s15_s7 }
   0x9   :  { %p73_p3 = scmp.ne.s32.totalorder %s15_s7, %s72_s15  ;;  %p78_p5 = scmp.lt.s32.totalorder %s72_s15, %s72_s15 }
   0xb   :  { %p79_p6 = por %p78_p5, %p77_p4 }
   0xd   :  { %p80_p7 = pnand %p79_p6, %p73_p3 }
   0xf   :  { %83 = shalt.err (!%p80_p7)
}
  0x10   :  { %17 = dma.hbm_to_vmem [thread:$0]  %s149_s0, 384, %s15_s7, [#allocation3]  }
  0x11   :  { %106 = dma.done.wait [#allocation3], 384  }
  0x12   :  { %107 = vsyncadd [#allocation3], 4294966912  ;;  %v21_v0 = vld [vmem:[#allocation2] sm:$0xff]  ;;  %v111_v1 = vmov 1e-07   ;;  %s112_s18 = smov 32  }
  0x13   :  { %vm23_vm0 = vcmp.lt.f32.partialorder %v21_v0, 0.0  ;;  %v22_v5 = vld [vmem:[#allocation2 + $0x10] sm:$0xff]  ;;  %s113_s19 = smov 96   ;;  %s114_s20 = smov [#allocation5]   ;;  %vm37_vm1 = vcmask 261120  }
  0x14   :  { %v24_v2 = vsel %vm23_vm0, -1e-07, %v111_v1  ;;  %s45_s21 = sshll.u32 %s114_s20, 4  ;;  %s46_s21 = int_to_ptr.vmem [resolvable:$true] %s45_s21 }
  0x15   :  { %v25_v3 = vadd.f32 %v24_v2, %v21_v0  ;;  %s84_s0 = scalar_lea.vmem %s46_s21, 128  ;;  %p89_p9 = scmp.lt.s32.totalorder %s46_s21, %s46_s21 }
  0x16   :  { %p85_p8 = scmp.ne.s32.totalorder %s46_s21, %s84_s0  ;;  %p90_p10 = scmp.lt.s32.totalorder %s84_s0, %s84_s0 }
  0x17   :  { %27 = vrot.lane.b32.xlu0 %v25_v3, %s112_s18 }
  0x18   :  { %p91_p11 = por %p90_p10, %p89_p9 }
  0x1a   :  { %p92_p12 = pnand %p91_p11, %p85_p8 }
  0x89   :  { %v28_v4 = vpop.permute.xlu0 %27 }
  0x8a   :  { %60 = vrcp.f32 %v28_v4 }
  0x94   :  { %v61_v6 = vpop.eup %60 }
  0x95   :  { %v31_v7 = vmul.f32 %v61_v6, %v22_v5 }
  0x97   :  { %v54_v8 = vadd.f32 -1.0, %v31_v7 }
  0x99   :  { %34 = vrot.lane.b32.xlu0 %v54_v8, %s113_s19 }
 0x10b   :  { %v35_v9 = vpop.permute.xlu0 %34 }
 0x10c   :  { %38 = vst.msk [vmem:[#allocation5] sm:$0xff] %vm37_vm1, %v35_v9 }
 0x10d   :  { %95 = shalt.err (!%p92_p12)
}
 0x10e   :  { %s96_s24 = scalar_lea.hbm %s150_s1, 128 }
 0x10f   :  { %p97_p13 = scmp.ne.s32.totalorder %s150_s1, %s96_s24  ;;  %p100_p0 = scmp.lt.u32.totalorder %s96_s24, %s150_s1 }
 0x111   :  { %p102_p1 = pnand %p100_p0, %p97_p13 }
 0x113   :  { %105 = shalt.err (!%p102_p1)
}
 0x114   :  { %48 = dma.vmem_to_hbm [thread:$0]  %s46_s21, 128, %s150_s1, [#allocation4]  }
 0x115   :  { %108 = dma.done.wait [#allocation4], 128  }
 0x116   :  { %109 = vsyncadd [#allocation4], 4294967168 }
 0x117   :  { %52 = vsyncpa [#allocation3], 1 }
 0x118   :  { %53 = vsyncpa [#allocation4], 1 }

</bundles_post_ra>
